<compile_context>
chip_gen: v7x
topology: tpu7x:2x2x1
jax: 0.10.0
libtpu: 0.0.40
codegen_flags: <defaults>
</compile_context>

<pallas_src>
import functools

import jax
import jax.numpy as jnp
from jax.experimental import pallas as pl
from jax.experimental.pallas import tpu as pltpu


def _round_up(x, m):
    return ((x + m - 1) // m) * m


def mlp_kernel(xt_ref, w1_ref, w2_ref, w3_ref, w4_ref, b_ref, o_ref):
    """Fused 4-layer MLP, batch-on-lanes.

    xt_ref : (4, TB)   flattened input, transposed (features x batch-tile)
    w*_ref : (out, in) PyTorch-layout weights -> h = W @ x (no transposes)
    b_ref  : (33, 1)   concatenated biases [b1(8); b2(16); b3(8); b4(1)]
    o_ref  : (1, TB)   lane-dense logits row
    """
    x = xt_ref[...]                                                  # (4, TB)
    b = b_ref[...]                                                   # (33, 1)

    # NOTE: at K<=16 / out<=16 these dots barely exercise the MXU; kept as
    # jnp.dot for robust lowering — the kernel is overhead / DMA bound here.
    h = jnp.dot(w1_ref[...], x, preferred_element_type=jnp.float32)
    h = jnp.maximum(h + b[0:8], 0.0)                                 # (8, TB)

    h = jnp.dot(w2_ref[...], h, preferred_element_type=jnp.float32)
    h = jnp.maximum(h + b[8:24], 0.0)                                # (16, TB)

    h = jnp.dot(w3_ref[...], h, preferred_element_type=jnp.float32)
    h = jnp.maximum(h + b[24:32], 0.0)                               # (8, TB)

    o_ref[...] = (
        jnp.dot(w4_ref[...], h, preferred_element_type=jnp.float32) + b[32:33]
    )                                                                # (1, TB)


@functools.partial(jax.jit, static_argnames=("tb",))
def mlp_forward(x, params, *, tb=1024):
    """x: (B, ...) -> flatten to (B, 4) -> logits (B, 1). Fully under one jit."""
    bsz = x.shape[0]
    x2d = x.reshape(bsz, -1).astype(jnp.float32)                     # nn.Flatten
    assert x2d.shape[1] == 4, "model expects 4 flattened input features"

    (w1, b1), (w2, b2), (w3, b3), (w4, b4) = params
    w1 = w1.astype(jnp.float32)
    w2 = w2.astype(jnp.float32)
    w3 = w3.astype(jnp.float32)
    w4 = w4.astype(jnp.float32)
    b_all = (
        jnp.concatenate([b1, b2, b3, b4]).reshape(-1, 1).astype(jnp.float32)
    )                                                                # (33, 1)

    # Batch on lanes: pad B to a multiple of a 128-aligned tile.
    tb = _round_up(tb, 128)
    tb_eff = min(tb, _round_up(bsz, 128))                            # one tile if small
    padded_b = _round_up(bsz, tb_eff)
    xt = x2d.T                                                       # (4, B)
    if padded_b != bsz:
        xt = jnp.pad(xt, ((0, 0), (0, padded_b - bsz)))

    resident = lambda i: (0, 0)  # weights/biases pinned in VMEM across the grid

    out = pl.pallas_call(
        mlp_kernel,
        out_shape=jax.ShapeDtypeStruct((1, padded_b), jnp.float32),
        grid=(padded_b // tb_eff,),
        in_specs=[
            pl.BlockSpec((4, tb_eff), lambda i: (0, i)),             # x tile
            pl.BlockSpec((8, 4), resident),                          # w1
            pl.BlockSpec((16, 8), resident),                         # w2
            pl.BlockSpec((8, 16), resident),                         # w3
            pl.BlockSpec((1, 8), resident),                          # w4
            pl.BlockSpec((33, 1), resident),                         # biases
        ],
        out_specs=pl.BlockSpec((1, tb_eff), lambda i: (0, i)),
        compiler_params=pltpu.CompilerParams(
            dimension_semantics=("parallel",),                       # megacore on v7x
        ),
    )(xt, w1, w2, w3, w4, b_all)

    return out[:, :bsz].T                                            # (B, 1)


def init_params(key):
    """Kaiming-normal weights (fan_in, gain=sqrt(2)), zero biases (PyTorch init)."""
    def kaiming(k, out_f, in_f):
        std = jnp.sqrt(2.0 / in_f)
        return jax.random.normal(k, (out_f, in_f), dtype=jnp.float32) * std

    k1, k2, k3, k4 = jax.random.split(key, 4)
    return [
        (kaiming(k1, 8, 4), jnp.zeros((8,), jnp.float32)),
        (kaiming(k2, 16, 8), jnp.zeros((16,), jnp.float32)),
        (kaiming(k3, 8, 16), jnp.zeros((8,), jnp.float32)),
        (kaiming(k4, 1, 8), jnp.zeros((1,), jnp.float32)),
    ]


def ref_forward(x, params):
    """Pure-JAX reference (same math as the PyTorch module)."""
    h = x.reshape(x.shape[0], -1).astype(jnp.float32)
    (w1, b1), (w2, b2), (w3, b3), (w4, b4) = params
    h = jnp.maximum(h @ w1.T + b1, 0.0)
    h = jnp.maximum(h @ w2.T + b2, 0.0)
    h = jnp.maximum(h @ w3.T + b3, 0.0)
    return h @ w4.T + b4


if __name__ == "__main__":
    key = jax.random.PRNGKey(0)
    pkey, xkey1, xkey2, bkey = jax.random.split(key, 4)

    params = init_params(pkey)

    # Small input: batch=8, flattens to 4 features ((8, 2, 2) -> (8, 4)); single tile.
    x_small = jax.random.normal(xkey1, (8, 2, 2), dtype=jnp.float32)
    logits = jax.block_until_ready(mlp_forward(x_small, params))
    assert logits.shape == (8, 1)
    assert jnp.allclose(logits, ref_forward(x_small, params), atol=1e-5, rtol=1e-5)

    # Larger batch exercises the batch grid (padding 3000 -> 3072, three 1024-lane tiles).
    x_big = jax.random.normal(xkey2, (3000, 4), dtype=jnp.float32)
    logits_big = jax.block_until_ready(mlp_forward(x_big, params))
    assert logits_big.shape == (3000, 1)
    assert jnp.allclose(logits_big, ref_forward(x_big, params), atol=1e-5, rtol=1e-5)

    # Extra check with non-zero biases to exercise the concatenated-bias path.
    bk = jax.random.split(bkey, 4)
    params_nb = [
        (w, jax.random.normal(k, b.shape, jnp.float32) * 0.1)
        for (w, b), k in zip(params, bk)
    ]
    logits_nb = jax.block_until_ready(mlp_forward(x_big, params_nb))
    assert jnp.allclose(logits_nb, ref_forward(x_big, params_nb), atol=1e-5, rtol=1e-5)

    print("KERNEL_OK")
</pallas_src>

<mosaic_0001>
module attributes {stable_mosaic.version = 11 : i64} {
  func.func @mlp_kernel(%arg0: i32, %arg1: memref<4x128xf32, #tpu.memory_space<vmem>>, %arg2: memref<8x4xf32, #tpu.memory_space<vmem>>, %arg3: memref<16x8xf32, #tpu.memory_space<vmem>>, %arg4: memref<8x16xf32, #tpu.memory_space<vmem>>, %arg5: memref<1x8xf32, #tpu.memory_space<vmem>>, %arg6: memref<33x1xf32, #tpu.memory_space<vmem>>, %arg7: memref<1x128xf32, #tpu.memory_space<vmem>>) attributes {dimension_semantics = [#tpu.dimension_semantics<parallel>], iteration_bounds = array<i64: 1>, scalar_prefetch = 0 : i64, scratch_operands = 0 : i64, tpu.core_type = #tpu.core_type<tc>, window_params = [{transform_indices = @transform_0, window_bounds = array<i64: 4, 128>}, {pipeline_mode = #tpu.pipeline_mode<synchronous>, transform_indices = @transform_1, window_bounds = array<i64: 8, 4>}, {pipeline_mode = #tpu.pipeline_mode<synchronous>, transform_indices = @transform_2, window_bounds = array<i64: 16, 8>}, {pipeline_mode = #tpu.pipeline_mode<synchronous>, transform_indices = @transform_3, window_bounds = array<i64: 8, 16>}, {pipeline_mode = #tpu.pipeline_mode<synchronous>, transform_indices = @transform_4, window_bounds = array<i64: 1, 8>}, {pipeline_mode = #tpu.pipeline_mode<synchronous>, transform_indices = @transform_5, window_bounds = array<i64: 33, 1>}, {transform_indices = @transform_6, window_bounds = array<i64: 1, 128>}]} {
    %c0 = arith.constant 0 : index
    %c0_0 = arith.constant 0 : index
    %0 = vector.load %arg1[%c0, %c0_0] : memref<4x128xf32, #tpu.memory_space<vmem>>, vector<4x128xf32>
    %c0_1 = arith.constant 0 : index
    %c0_2 = arith.constant 0 : index
    %1 = vector.load %arg6[%c0_1, %c0_2] : memref<33x1xf32, #tpu.memory_space<vmem>>, vector<33x1xf32>
    %c0_3 = arith.constant 0 : index
    %c0_4 = arith.constant 0 : index
    %2 = vector.load %arg2[%c0_3, %c0_4] : memref<8x4xf32, #tpu.memory_space<vmem>>, vector<8x4xf32>
    %cst = arith.constant dense<0.000000e+00> : vector<8x128xf32>
    %3 = tpu.matmul %2, %0, %cst {dimension_numbers = #tpu.dot_dimension_numbers<[1], [0], [0], [1], [0, 0, 1, 1], [], []>} : vector<8x4xf32>, vector<4x128xf32>, vector<8x128xf32> -> vector<8x128xf32>
    %4 = vector.extract_strided_slice %1 {offsets = [0, 0], sizes = [8, 1], strides = [1, 1]} : vector<33x1xf32> to vector<8x1xf32>
    %5 = vector.broadcast %4 : vector<8x1xf32> to vector<8x128xf32>
    %6 = arith.addf %3, %5 : vector<8x128xf32>
    %cst_5 = arith.constant 0.000000e+00 : f32
    %7 = vector.broadcast %cst_5 : f32 to vector<8x128xf32>
    %8 = arith.maximumf %6, %7 : vector<8x128xf32>
    %c0_6 = arith.constant 0 : index
    %c0_7 = arith.constant 0 : index
    %9 = vector.load %arg3[%c0_6, %c0_7] : memref<16x8xf32, #tpu.memory_space<vmem>>, vector<16x8xf32>
    %cst_8 = arith.constant dense<0.000000e+00> : vector<16x128xf32>
    %10 = tpu.matmul %9, %8, %cst_8 {dimension_numbers = #tpu.dot_dimension_numbers<[1], [0], [0], [1], [0, 0, 1, 1], [], []>} : vector<16x8xf32>, vector<8x128xf32>, vector<16x128xf32> -> vector<16x128xf32>
    %11 = vector.extract_strided_slice %1 {offsets = [8, 0], sizes = [16, 1], strides = [1, 1]} : vector<33x1xf32> to vector<16x1xf32>
    %12 = vector.broadcast %11 : vector<16x1xf32> to vector<16x128xf32>
    %13 = arith.addf %10, %12 : vector<16x128xf32>
    %cst_9 = arith.constant 0.000000e+00 : f32
    %14 = vector.broadcast %cst_9 : f32 to vector<16x128xf32>
    %15 = arith.maximumf %13, %14 : vector<16x128xf32>
    %c0_10 = arith.constant 0 : index
    %c0_11 = arith.constant 0 : index
    %16 = vector.load %arg4[%c0_10, %c0_11] : memref<8x16xf32, #tpu.memory_space<vmem>>, vector<8x16xf32>
    %cst_12 = arith.constant dense<0.000000e+00> : vector<8x128xf32>
    %17 = tpu.matmul %16, %15, %cst_12 {dimension_numbers = #tpu.dot_dimension_numbers<[1], [0], [0], [1], [0, 0, 1, 1], [], []>} : vector<8x16xf32>, vector<16x128xf32>, vector<8x128xf32> -> vector<8x128xf32>
    %18 = vector.extract_strided_slice %1 {offsets = [24, 0], sizes = [8, 1], strides = [1, 1]} : vector<33x1xf32> to vector<8x1xf32>
    %19 = vector.broadcast %18 : vector<8x1xf32> to vector<8x128xf32>
    %20 = arith.addf %17, %19 : vector<8x128xf32>
    %cst_13 = arith.constant 0.000000e+00 : f32
    %21 = vector.broadcast %cst_13 : f32 to vector<8x128xf32>
    %22 = arith.maximumf %20, %21 : vector<8x128xf32>
    %c0_14 = arith.constant 0 : index
    %c0_15 = arith.constant 0 : index
    %23 = vector.load %arg5[%c0_14, %c0_15] : memref<1x8xf32, #tpu.memory_space<vmem>>, vector<1x8xf32>
    %cst_16 = arith.constant dense<0.000000e+00> : vector<1x128xf32>
    %24 = tpu.matmul %23, %22, %cst_16 {dimension_numbers = #tpu.dot_dimension_numbers<[1], [0], [0], [1], [0, 0, 1, 1], [], []>} : vector<1x8xf32>, vector<8x128xf32>, vector<1x128xf32> -> vector<1x128xf32>
    %25 = vector.extract_strided_slice %1 {offsets = [32, 0], sizes = [1, 1], strides = [1, 1]} : vector<33x1xf32> to vector<1x1xf32>
    %26 = vector.broadcast %25 : vector<1x1xf32> to vector<1x128xf32>
    %27 = arith.addf %24, %26 : vector<1x128xf32>
    %c0_17 = arith.constant 0 : index
    %c0_18 = arith.constant 0 : index
    %28 = vector.load %arg7[%c0_17, %c0_18] : memref<1x128xf32, #tpu.memory_space<vmem>>, vector<1x128xf32>
    tpu.vector_store %arg7[%c0_17, %c0_18], %27 {strides = array<i32>} : memref<1x128xf32, #tpu.memory_space<vmem>>, vector<1x128xf32>,
    return
  }
  func.func @transform_0(%arg0: i32) -> (i32, i32) {
    %c0_i32 = arith.constant 0 : i32
    %c0_i32_0 = arith.constant 0 : i32
    return %c0_i32, %arg0 : i32, i32
  }
  func.func @transform_1(%arg0: i32) -> (i32, i32) {
    %c0_i32 = arith.constant 0 : i32
    %c0_i32_0 = arith.constant 0 : i32
    %c0_i32_1 = arith.constant 0 : i32
    return %c0_i32, %c0_i32_0 : i32, i32
  }
  func.func @transform_2(%arg0: i32) -> (i32, i32) {
    %c0_i32 = arith.constant 0 : i32
    %c0_i32_0 = arith.constant 0 : i32
    %c0_i32_1 = arith.constant 0 : i32
    return %c0_i32, %c0_i32_0 : i32, i32
  }
  func.func @transform_3(%arg0: i32) -> (i32, i32) {
    %c0_i32 = arith.constant 0 : i32
    %c0_i32_0 = arith.constant 0 : i32
    %c0_i32_1 = arith.constant 0 : i32
    return %c0_i32, %c0_i32_0 : i32, i32
  }
  func.func @transform_4(%arg0: i32) -> (i32, i32) {
    %c0_i32 = arith.constant 0 : i32
    %c0_i32_0 = arith.constant 0 : i32
    %c0_i32_1 = arith.constant 0 : i32
    return %c0_i32, %c0_i32_0 : i32, i32
  }
  func.func @transform_5(%arg0: i32) -> (i32, i32) {
    %c0_i32 = arith.constant 0 : i32
    %c0_i32_0 = arith.constant 0 : i32
    %c0_i32_1 = arith.constant 0 : i32
    return %c0_i32, %c0_i32_0 : i32, i32
  }
  func.func @transform_6(%arg0: i32) -> (i32, i32) {
    %c0_i32 = arith.constant 0 : i32
    %c0_i32_0 = arith.constant 0 : i32
    return %c0_i32, %arg0 : i32, i32
  }
}

</mosaic_0001>

<bundles_post_ra>
// kernel: mlp_forward.1
= control target key start
LH: loop header
LB: loop body
LE: loop exit
PB: predicated region body
PF: predicated region fallthrough
CT: control target
= control target key end

     0   :  { %vm39_vm0 = vcmask 1043456   ;;  %vm35_vm1 = vcmask 31744   ;;  %v422_v0 = vmov 0.0   ;;  %vm423_vm2 = vmmov 0   ;;  %s503_s0 = inlined_call_operand.vmem [shape: f32[4,128], index: 0, kind: input, shape index: {}]   ;;  %s504_s1 = inlined_call_operand.vmem [shape: f32[8,4], index: 1, kind: input, shape index: {}]   ;;  %s505_s5 = inlined_call_operand.vmem [shape: f32[33,1], index: 5, kind: input, shape index: {}]   ;;  %s506_s2 = inlined_call_operand.vmem [shape: f32[16,8], index: 2, kind: input, shape index: {}]   ;;  %s507_s3 = inlined_call_operand.vmem [shape: f32[8,16], index: 3, kind: input, shape index: {}]   ;;  %s508_s4 = inlined_call_operand.vmem [shape: f32[1,8], index: 4, kind: input, shape index: {}]   ;;  %s509_s6 = inlined_call_operand.vmem [shape: f32[1,128], index: 6, kind: output, shape index: {}]  }
   0x1   :  { %391 = vmatprep.subr.mxu0 %v422_v0  ;;  %v23_v1 = vld [vmem:[%s503_s0] sm:$0xf]  ;;  %393 = vmatprep.mubr.msk.f32.mxu0 %vm423_vm2, %v422_v0  ;;  %v424_v4 = vmov 0   ;;  %v25_v5 = vld [vmem:[%s505_s5 + $0x8] sm:$0xff]  ;;  %vm126_vm3 = vcmask 64512   ;;  %v26_v8 = vld [vmem:[%s505_s5 + $0x10] sm:$0xff] }
   0x2   :  { %v29_v2 = vld [vmem:[%s504_s1] sm:$0xff]  ;;  %392 = vmatpush3.msk.msra.mxu0 %vm39_vm0, %v23_v1  ;;  %420 = vset.pattern.permute.xlu0 %v424_v4  ;;  %v27_v9 = vld [vmem:[%s505_s5 + $0x18] sm:$0xff]  ;;  %v115_v15 = vld [vmem:[%s506_s2 + $0x8] sm:$0xff]  ;;  %v425_v16 = vmov 0.0|0.0   ;;  %vm216_vm4 = vcmask 130048  }
   0x3   :  { %v24_v3 = vld [vmem:[%s505_s5] sm:$0xff]  ;;  %394 = vmatmul.mubr.msk.f32.vlgmr.msra.gmra.mrb[0].mxu0 %vm35_vm1, %v29_v2  ;;  %421 = vset.pattern.permute.xlu1 %v424_v4 }
   0x4   :  { %32 = vperm.xlu0 %420, %v24_v3   ;;  %405 = vmatprep.mubr.msk.f32.mxu0 %vm423_vm2, %v422_v0  ;;  %v28_v6 = vld [vmem:[%s505_s5 + $0x20] sm:$0x1] }
   0x5   :  { %v114_v7 = vld [vmem:[%s506_s2] sm:$0xff]  ;;  %123 = vperm.xlu1 %421, %v26_v8   ;;  %413 = vmatprep.subr.bf16.mxu0 %v425_v16 }
   0x6   :  { %398 = vmatprep.mubr.msk.f32.mxu1 %vm126_vm3, %v114_v7  ;;  %v210_v26 = vld [vmem:[%s507_s3] sm:$0xff] }
   0x7   :  { %v291_v32 = vld [vmem:[%s508_s4] sm:$0x1] }
   0x8   :  { %118 = vperm.xlu0 %420, %v25_v5  }
   0x9   :  { %213 = vperm.xlu1 %421, %v27_v9  }
   0xc   :  { %294 = vperm.xlu0 %420, %v28_v6  }
  0x83   :  { %v33_v10 = vpop.permute.xlu0 %32 }
  0x84   :  { %v124_v17 = vpop.permute.xlu1 %123 }
  0x87   :  { %v119_v19 = vpop.permute.xlu0 %118 }
  0x88   :  { %v214_v27 = vpop.permute.xlu1 %213 }
  0x8b   :  { %v295_v33 = vpop.permute.xlu0 %294 }
  0xd6   :  { %v109_v11 = vpop.f32.mrb[0].mxu0 }
  0xd7   :  { %v110_v12 = vadd.f32 %v109_v11, %v33_v10  ;;  %v395_v13 = vpop.f32.mrb[1].mxu0 }
  0xd9   :  { %v113_v14 = vmax.f32 %v110_v12, 0.0 }
  0xdb   :  { %396 = vmatprep.subr.mxu1 %v113_v14 }
  0xdc   :  { %397 = vmatpush3.msra.mxu1 %v113_v14 }
  0xdd   :  { %399 = vmatmul.mubr.msk.f32.vlgmr.msra.gmra.mrb[0].mxu1 %vm126_vm3, %v115_v15  ;;  %408 = vmatprep.subr.mxu1 %v422_v0 }
  0xde   :  { %410 = vmatprep.mubr.msk.f32.mxu1 %vm423_vm2, %v422_v0 }
 0x1b0   :  { %v400_v18 = vpop.f32.mrb[0].mxu1 }
 0x1b1   :  { %v205_v20 = vadd.f32 %v400_v18, %v124_v17  ;;  %v199_v21 = vpop.f32.mrb[1].mxu1 }
 0x1b2   :  { %v200_v22 = vadd.f32 %v199_v21, %v119_v19 }
 0x1b3   :  { %v209_v23 = vmax.f32 %v205_v20, 0.0 }
 0x1b4   :  { %v208_v24 = vmax.f32 %v200_v22, 0.0 }
 0x1b6   :  { %v414_v25 = vpack.c.bf16 %v209_v23, %v208_v24 }
 0x1b8   :  { %415 = vmatpush3.bf16.msra.mxu0 %v414_v25 }
 0x1bb   :  { %406 = vmatmul.mubr.msk.f32.vlgmr.msra.gmra.mrb[2].mxu0 %vm216_vm4, %v210_v26 }
 0x28e   :  { %v286_v28 = vpop.f32.mrb[2].mxu0 }
 0x28f   :  { %v287_v29 = vadd.f32 %v286_v28, %v214_v27  ;;  %v407_v30 = vpop.f32.mrb[3].mxu0 }
 0x291   :  { %v290_v31 = vmax.f32 %v287_v29, 0.0 }
 0x293   :  { %409 = vmatpush3.msra.mxu1 %v290_v31 }
 0x294   :  { %411 = vmatmul.mubr.msk.f32.vlgmr.msra.gmra.mrb[2].mxu1 %vm126_vm3, %v291_v32 }
 0x367   :  { %v366_v34 = vpop.f32.mrb[2].mxu1 }
 0x368   :  { %v367_v35 = vadd.f32 %v366_v34, %v295_v33  ;;  %v412_v36 = vpop.f32.mrb[3].mxu1 }
 0x36a   :  { %370 = vst [vmem:[%s509_s6] sm:$0x1] %v367_v35 }

</bundles_post_ra>
